<compile_context>
chip_gen: v6e
topology: v6e:2x2x1
jax: 0.10.0
libtpu: 0.0.40
codegen_flags: <defaults>
</compile_context>

<pallas_src>
import jax
import jax.numpy as jnp
from jax.experimental import pallas as pl
from jax.experimental.pallas import tpu as pltpu

HIDDEN_SIZE = 30
INPUT_SIZE = 10
OUTPUT_SIZE = 1


def _round_up(n, m):
    return ((n + m - 1) // m) * m


# Hardware-friendly padded dims (sublane multiple of 8).
H_PAD = _round_up(HIDDEN_SIZE, 8)       # 30 -> 32
F_PAD = _round_up(INPUT_SIZE, 8)        # 10 -> 16
OUT_PAD = _round_up(OUTPUT_SIZE, 8)     # 1  -> 8
PACK_K = max(H_PAD, F_PAD)              # packed-weight minor dim (32)


def _tenny_kernel(x_ref, w_ref, b_ref, o_ref):
    """x_ref: [F_PAD, TB], w_ref: [5, H_PAD, PACK_K], b_ref: [5, H_PAD, 1],
    o_ref: [OUT_PAD, TB].  Batch is on lanes; every layer is W^T @ X."""
    h = x_ref[...]                                                   # [F_PAD, TB]

    # fc1 + ReLU
    h = jnp.dot(w_ref[0, :, :F_PAD], h,
                preferred_element_type=jnp.float32) + b_ref[0]
    h = jnp.maximum(h, 0.0)

    # fc2 + ReLU
    h = jnp.dot(w_ref[1, :, :H_PAD], h,
                preferred_element_type=jnp.float32) + b_ref[1]
    h = jnp.maximum(h, 0.0)

    # dropout(p=0.5) — identity at inference time (module.eval()).
    # TODO(synk): training-mode dropout (pltpu.prng_random_bits mask + 2x scale) not emitted.

    # fc3 + ReLU
    h = jnp.dot(w_ref[2, :, :H_PAD], h,
                preferred_element_type=jnp.float32) + b_ref[2]
    h = jnp.maximum(h, 0.0)

    # fc4 + ReLU
    h = jnp.dot(w_ref[3, :, :H_PAD], h,
                preferred_element_type=jnp.float32) + b_ref[3]
    h = jnp.maximum(h, 0.0)

    # fc5 (no activation) — only the OUT_PAD leading rows are needed.
    y = jnp.dot(w_ref[4, :OUT_PAD, :H_PAD], h,
                preferred_element_type=jnp.float32) + b_ref[4, :OUT_PAD]

    o_ref[...] = y.astype(o_ref.dtype)


def pack_params(params):
    """Pack per-layer (w [in,out], b [1,out]) into zero-padded stacked buffers.

    w_pack[k] holds W_k^T ([out,in]) zero-padded to [H_PAD, PACK_K];
    b_pack[k] holds b_k zero-padded to [H_PAD, 1].  Zero padding is exact:
    padded rows stay exactly 0 through ReLU and downstream matmuls.
    """
    w_pack = jnp.zeros((5, H_PAD, PACK_K), jnp.float32)
    b_pack = jnp.zeros((5, H_PAD, 1), jnp.float32)
    for k in range(5):
        wt = params[f"w{k + 1}"].T            # [out, in]
        b = params[f"b{k + 1}"][0]            # [out]
        w_pack = w_pack.at[k, :wt.shape[0], :wt.shape[1]].set(wt)
        b_pack = b_pack.at[k, :b.shape[0], 0].set(b)
    return w_pack, b_pack


def tenny_forward(x, w_pack, b_pack, *, tb_max=512):
    """x: [B, INPUT_SIZE] float32 -> [B, OUTPUT_SIZE] float32."""
    B, F = x.shape
    assert F == INPUT_SIZE

    tb = min(tb_max, _round_up(B, 128))       # lane-aligned batch tile
    b_pad = _round_up(B, tb)
    grid = (b_pad // tb,)

    # Pad + transpose ONCE in the wrapper: [B, F] -> [F_PAD, b_pad].
    xt = jnp.zeros((F_PAD, b_pad), jnp.float32).at[:F, :B].set(x.T)

    weight_bytes = (w_pack.size + b_pack.size) * 4
    cost = pl.CostEstimate(
        flops=2 * b_pad * (F_PAD * H_PAD + 3 * H_PAD * H_PAD + H_PAD * OUT_PAD),
        transcendentals=0,
        bytes_accessed=(F_PAD + OUT_PAD) * b_pad * 4 + weight_bytes,
    )

    out = pl.pallas_call(
        _tenny_kernel,
        out_shape=jax.ShapeDtypeStruct((OUT_PAD, b_pad), jnp.float32),
        grid=grid,
        in_specs=[
            pl.BlockSpec((F_PAD, tb), lambda i: (0, i)),             # x tile
            pl.BlockSpec((5, H_PAD, PACK_K), lambda i: (0, 0, 0)),   # weights (resident)
            pl.BlockSpec((5, H_PAD, 1), lambda i: (0, 0, 0)),        # biases  (resident)
        ],
        out_specs=pl.BlockSpec((OUT_PAD, tb), lambda i: (0, i)),
        compiler_params=pltpu.CompilerParams(
            dimension_semantics=("parallel",)),
        cost_estimate=cost,
    )(xt, w_pack, b_pack)

    return out[:OUTPUT_SIZE, :B].T            # [B, 1]


def init_params(key, input_size, hidden_size, output_size):
    """Deterministic init mimicking nn.Linear default (uniform(+-1/sqrt(fan_in))).
    Weights stored as [in, out] (transposed vs PyTorch's [out, in])."""
    dims = [(input_size, hidden_size),
            (hidden_size, hidden_size),
            (hidden_size, hidden_size),
            (hidden_size, hidden_size),
            (hidden_size, output_size)]
    params = {}
    for i, (fan_in, fan_out) in enumerate(dims, start=1):
        key, kw, kb = jax.random.split(key, 3)
        bound = 1.0 / jnp.sqrt(jnp.float32(fan_in))
        params[f"w{i}"] = jax.random.uniform(
            kw, (fan_in, fan_out), jnp.float32, minval=-bound, maxval=bound)
        params[f"b{i}"] = jax.random.uniform(
            kb, (1, fan_out), jnp.float32, minval=-bound, maxval=bound)
    return params


def tenny_reference(x, params):
    """Pure-JAX reference for correctness check (eval mode: dropout = identity)."""
    h = jax.nn.relu(x @ params["w1"] + params["b1"])
    h = jax.nn.relu(h @ params["w2"] + params["b2"])
    h = jax.nn.relu(h @ params["w3"] + params["b3"])
    h = jax.nn.relu(h @ params["w4"] + params["b4"])
    return h @ params["w5"] + params["b5"]


if __name__ == "__main__":
    key = jax.random.PRNGKey(0)
    key, kx1, kx2 = jax.random.split(key, 3)

    params = init_params(key, INPUT_SIZE, HIDDEN_SIZE, OUTPUT_SIZE)
    w_pack, b_pack = pack_params(params)

    # Small batch (single grid step, batch padded to one 128-wide lane tile).
    x_small = jax.random.normal(kx1, (8, INPUT_SIZE), jnp.float32)
    out_small = jax.block_until_ready(tenny_forward(x_small, w_pack, b_pack))
    ref_small = tenny_reference(x_small, params)
    assert out_small.shape == (8, OUTPUT_SIZE), out_small.shape
    assert jnp.allclose(out_small, ref_small, atol=1e-4, rtol=1e-4), \
        "mismatch vs JAX reference (small batch)"

    # Non-multiple batch exercising the batch grid (2 tiles of 512).
    x_big = jax.random.normal(kx2, (600, INPUT_SIZE), jnp.float32)
    out_big = jax.block_until_ready(tenny_forward(x_big, w_pack, b_pack))
    ref_big = tenny_reference(x_big, params)
    assert out_big.shape == (600, OUTPUT_SIZE), out_big.shape
    assert jnp.allclose(out_big, ref_big, atol=1e-4, rtol=1e-4), \
        "mismatch vs JAX reference (tiled batch)"

    print("KERNEL_OK")
</pallas_src>

<mosaic_0001>
module attributes {stable_mosaic.version = 11 : i64} {
  func.func @_tenny_kernel(%arg0: i32, %arg1: memref<16x128xf32, #tpu.memory_space<vmem>>, %arg2: memref<5x32x32xf32, #tpu.memory_space<vmem>>, %arg3: memref<5x32x1xf32, #tpu.memory_space<vmem>>, %arg4: memref<8x128xf32, #tpu.memory_space<vmem>>) attributes {dimension_semantics = [#tpu.dimension_semantics<parallel>], iteration_bounds = array<i64: 1>, scalar_prefetch = 0 : i64, scratch_operands = 0 : i64, tpu.core_type = #tpu.core_type<tc>, window_params = [{transform_indices = @transform_0, window_bounds = array<i64: 16, 128>}, {pipeline_mode = #tpu.pipeline_mode<synchronous>, transform_indices = @transform_1, window_bounds = array<i64: 5, 32, 32>}, {pipeline_mode = #tpu.pipeline_mode<synchronous>, transform_indices = @transform_2, window_bounds = array<i64: 5, 32, 1>}, {transform_indices = @transform_3, window_bounds = array<i64: 8, 128>}]} {
    %c0 = arith.constant 0 : index
    %c0_0 = arith.constant 0 : index
    %0 = vector.load %arg1[%c0, %c0_0] : memref<16x128xf32, #tpu.memory_space<vmem>>, vector<16x128xf32>
    %c0_1 = arith.constant 0 : index
    %c0_2 = arith.constant 0 : index
    %c0_3 = arith.constant 0 : index
    %1 = vector.load %arg2[%c0_1, %c0_2, %c0_3] : memref<5x32x32xf32, #tpu.memory_space<vmem>>, vector<1x32x16xf32>
    %2 = vector.shape_cast %1 : vector<1x32x16xf32> to vector<32x16xf32>
    %cst = arith.constant dense<0.000000e+00> : vector<32x128xf32>
    %3 = tpu.matmul %2, %0, %cst {dimension_numbers = #tpu.dot_dimension_numbers<[1], [0], [0], [1], [0, 0, 1, 1], [], []>} : vector<32x16xf32>, vector<16x128xf32>, vector<32x128xf32> -> vector<32x128xf32>
    %c0_4 = arith.constant 0 : index
    %c0_5 = arith.constant 0 : index
    %c0_6 = arith.constant 0 : index
    %4 = vector.load %arg3[%c0_4, %c0_5, %c0_6] : memref<5x32x1xf32, #tpu.memory_space<vmem>>, vector<1x32x1xf32>
    %5 = vector.shape_cast %4 : vector<1x32x1xf32> to vector<32x1xf32>
    %6 = vector.broadcast %5 : vector<32x1xf32> to vector<32x128xf32>
    %7 = arith.addf %3, %6 : vector<32x128xf32>
    %cst_7 = arith.constant 0.000000e+00 : f32
    %8 = vector.broadcast %cst_7 : f32 to vector<32x128xf32>
    %9 = arith.maximumf %7, %8 : vector<32x128xf32>
    %c1 = arith.constant 1 : index
    %c0_8 = arith.constant 0 : index
    %c0_9 = arith.constant 0 : index
    %10 = vector.load %arg2[%c1, %c0_8, %c0_9] : memref<5x32x32xf32, #tpu.memory_space<vmem>>, vector<1x32x32xf32>
    %11 = vector.shape_cast %10 : vector<1x32x32xf32> to vector<32x32xf32>
    %cst_10 = arith.constant dense<0.000000e+00> : vector<32x128xf32>
    %12 = tpu.matmul %11, %9, %cst_10 {dimension_numbers = #tpu.dot_dimension_numbers<[1], [0], [0], [1], [0, 0, 1, 1], [], []>} : vector<32x32xf32>, vector<32x128xf32>, vector<32x128xf32> -> vector<32x128xf32>
    %c1_11 = arith.constant 1 : index
    %c0_12 = arith.constant 0 : index
    %c0_13 = arith.constant 0 : index
    %13 = vector.load %arg3[%c1_11, %c0_12, %c0_13] : memref<5x32x1xf32, #tpu.memory_space<vmem>>, vector<1x32x1xf32>
    %14 = vector.shape_cast %13 : vector<1x32x1xf32> to vector<32x1xf32>
    %15 = vector.broadcast %14 : vector<32x1xf32> to vector<32x128xf32>
    %16 = arith.addf %12, %15 : vector<32x128xf32>
    %cst_14 = arith.constant 0.000000e+00 : f32
    %17 = vector.broadcast %cst_14 : f32 to vector<32x128xf32>
    %18 = arith.maximumf %16, %17 : vector<32x128xf32>
    %c2 = arith.constant 2 : index
    %c0_15 = arith.constant 0 : index
    %c0_16 = arith.constant 0 : index
    %19 = vector.load %arg2[%c2, %c0_15, %c0_16] : memref<5x32x32xf32, #tpu.memory_space<vmem>>, vector<1x32x32xf32>
    %20 = vector.shape_cast %19 : vector<1x32x32xf32> to vector<32x32xf32>
    %cst_17 = arith.constant dense<0.000000e+00> : vector<32x128xf32>
    %21 = tpu.matmul %20, %18, %cst_17 {dimension_numbers = #tpu.dot_dimension_numbers<[1], [0], [0], [1], [0, 0, 1, 1], [], []>} : vector<32x32xf32>, vector<32x128xf32>, vector<32x128xf32> -> vector<32x128xf32>
    %c2_18 = arith.constant 2 : index
    %c0_19 = arith.constant 0 : index
    %c0_20 = arith.constant 0 : index
    %22 = vector.load %arg3[%c2_18, %c0_19, %c0_20] : memref<5x32x1xf32, #tpu.memory_space<vmem>>, vector<1x32x1xf32>
    %23 = vector.shape_cast %22 : vector<1x32x1xf32> to vector<32x1xf32>
    %24 = vector.broadcast %23 : vector<32x1xf32> to vector<32x128xf32>
    %25 = arith.addf %21, %24 : vector<32x128xf32>
    %cst_21 = arith.constant 0.000000e+00 : f32
    %26 = vector.broadcast %cst_21 : f32 to vector<32x128xf32>
    %27 = arith.maximumf %25, %26 : vector<32x128xf32>
    %c3 = arith.constant 3 : index
    %c0_22 = arith.constant 0 : index
    %c0_23 = arith.constant 0 : index
    %28 = vector.load %arg2[%c3, %c0_22, %c0_23] : memref<5x32x32xf32, #tpu.memory_space<vmem>>, vector<1x32x32xf32>
    %29 = vector.shape_cast %28 : vector<1x32x32xf32> to vector<32x32xf32>
    %cst_24 = arith.constant dense<0.000000e+00> : vector<32x128xf32>
    %30 = tpu.matmul %29, %27, %cst_24 {dimension_numbers = #tpu.dot_dimension_numbers<[1], [0], [0], [1], [0, 0, 1, 1], [], []>} : vector<32x32xf32>, vector<32x128xf32>, vector<32x128xf32> -> vector<32x128xf32>
    %c3_25 = arith.constant 3 : index
    %c0_26 = arith.constant 0 : index
    %c0_27 = arith.constant 0 : index
    %31 = vector.load %arg3[%c3_25, %c0_26, %c0_27] : memref<5x32x1xf32, #tpu.memory_space<vmem>>, vector<1x32x1xf32>
    %32 = vector.shape_cast %31 : vector<1x32x1xf32> to vector<32x1xf32>
    %33 = vector.broadcast %32 : vector<32x1xf32> to vector<32x128xf32>
    %34 = arith.addf %30, %33 : vector<32x128xf32>
    %cst_28 = arith.constant 0.000000e+00 : f32
    %35 = vector.broadcast %cst_28 : f32 to vector<32x128xf32>
    %36 = arith.maximumf %34, %35 : vector<32x128xf32>
    %c4 = arith.constant 4 : index
    %c0_29 = arith.constant 0 : index
    %c0_30 = arith.constant 0 : index
    %37 = vector.load %arg2[%c4, %c0_29, %c0_30] : memref<5x32x32xf32, #tpu.memory_space<vmem>>, vector<1x8x32xf32>
    %38 = vector.shape_cast %37 : vector<1x8x32xf32> to vector<8x32xf32>
    %cst_31 = arith.constant dense<0.000000e+00> : vector<8x128xf32>
    %39 = tpu.matmul %38, %36, %cst_31 {dimension_numbers = #tpu.dot_dimension_numbers<[1], [0], [0], [1], [0, 0, 1, 1], [], []>} : vector<8x32xf32>, vector<32x128xf32>, vector<8x128xf32> -> vector<8x128xf32>
    %c4_32 = arith.constant 4 : index
    %c0_33 = arith.constant 0 : index
    %c0_34 = arith.constant 0 : index
    %40 = vector.load %arg3[%c4_32, %c0_33, %c0_34] : memref<5x32x1xf32, #tpu.memory_space<vmem>>, vector<1x8x1xf32>
    %41 = vector.shape_cast %40 : vector<1x8x1xf32> to vector<8x1xf32>
    %42 = vector.broadcast %41 : vector<8x1xf32> to vector<8x128xf32>
    %43 = arith.addf %39, %42 : vector<8x128xf32>
    %c0_35 = arith.constant 0 : index
    %c0_36 = arith.constant 0 : index
    %44 = vector.load %arg4[%c0_35, %c0_36] : memref<8x128xf32, #tpu.memory_space<vmem>>, vector<8x128xf32>
    tpu.vector_store %arg4[%c0_35, %c0_36], %43 {strides = array<i32>} : memref<8x128xf32, #tpu.memory_space<vmem>>, vector<8x128xf32>,
    return
  }
  func.func @transform_0(%arg0: i32) -> (i32, i32) {
    %c0_i32 = arith.constant 0 : i32
    %c0_i32_0 = arith.constant 0 : i32
    return %c0_i32, %arg0 : i32, i32
  }
  func.func @transform_1(%arg0: i32) -> (i32, i32, i32) {
    %c0_i32 = arith.constant 0 : i32
    %c0_i32_0 = arith.constant 0 : i32
    %c0_i32_1 = arith.constant 0 : i32
    %c0_i32_2 = arith.constant 0 : i32
    return %c0_i32, %c0_i32_0, %c0_i32_1 : i32, i32, i32
  }
  func.func @transform_2(%arg0: i32) -> (i32, i32, i32) {
    %c0_i32 = arith.constant 0 : i32
    %c0_i32_0 = arith.constant 0 : i32
    %c0_i32_1 = arith.constant 0 : i32
    %c0_i32_2 = arith.constant 0 : i32
    return %c0_i32, %c0_i32_0, %c0_i32_1 : i32, i32, i32
  }
  func.func @transform_3(%arg0: i32) -> (i32, i32) {
    %c0_i32 = arith.constant 0 : i32
    %c0_i32_0 = arith.constant 0 : i32
    return %c0_i32, %arg0 : i32, i32
  }
}

</mosaic_0001>

<bundles_post_ra>
// kernel: tpu_custom_call.1
= control target key start
LH: loop header
LB: loop body
LE: loop exit
PB: predicated region body
PF: predicated region fallthrough
CT: control target
= control target key end

     0   :  { %8 = vsyncpa [#allocation3], 0  ;;  %s999_s0 = inlined_call_operand.hbm [shape: f32[16,128], index: 0, kind: input, shape index: {}]   ;;  %s1000_s1 = inlined_call_operand.vmem [shape: f32[5,32,32], index: 1, kind: input, shape index: {}]   ;;  %s1001_s2 = inlined_call_operand.vmem [shape: f32[5,32,1], index: 2, kind: input, shape index: {}]   ;;  %s1002_s3 = inlined_call_operand.hbm [shape: f32[8,128], index: 3, kind: output, shape index: {}]  }
   0x1   :  { %9 = vsyncpa [#allocation4], 0  ;;  %s847_s12 = smov [#allocation2]  }
   0x2   :  { %s15_s13 = sshll.u32 %s847_s12, 4  ;;  %s16_s13 = int_to_ptr.vmem [resolvable:$true] %s15_s13 }
   0x3   :  { %s811_s14 = scalar_lea.vmem %s16_s13, 256  ;;  %p816_p1 = scmp.lt.s32.totalorder %s16_s13, %s16_s13 }
   0x4   :  { %p812_p0 = scmp.ne.s32.totalorder %s16_s13, %s811_s14  ;;  %p817_p2 = scmp.lt.s32.totalorder %s811_s14, %s811_s14 }
   0x6   :  { %p818_p3 = por %p817_p2, %p816_p1 }
   0x8   :  { %p819_p4 = pnand %p818_p3, %p812_p0 }
   0xa   :  { %822 = shalt.err (!%p819_p4)
}
   0xb   :  { %s848_s15 = smov 128   ;;  %s849_s16 = smov 8  }
   0xc   :  { %21 = dma.hbm_to_vmem [thread:$0]  %s999_s0, 256, %s16_s13, [#allocation3], %s848_s15, %s848_s15, %s849_s16  }
   0xd   :  { %843 = dma.done.wait [#allocation3], 256  }
   0xe   :  { %844 = vsyncadd [#allocation3], 4294967040  ;;  %v850_v0 = vmov 0   ;;  %vm59_vm0 = vcmask 130048   ;;  %v30_v1 = vld [vmem:[#allocation2 + $0x8] sm:$0xff]  ;;  %v29_v2 = vld [vmem:[#allocation2] sm:$0xff] }
   0xf   :  { %801 = vset.pattern.permute.xlu0 %v850_v0  ;;  %802 = vset.pattern.permute.xlu1 %v850_v0  ;;  %v31_v3 = vld [vmem:[%s1000_s1] sm:$0xff]  ;;  %v32_v4 = vld [vmem:[%s1000_s1 + $0x8] sm:$0xff]  ;;  %v38_v5 = vld [vmem:[%s1001_s2 + $0x18] sm:$0xff]  ;;  %vm191_vm1 = vcmask 261120   ;;  %vm852_vm2 = vmmov 0   ;;  %s853_s29 = smov [#allocation5]  }
  0x10   :  { %731 = vmatprep.subr.mxu0 %v30_v1  ;;  %735 = vmatprep.mubr.msk.f32.mxu0 %vm59_vm0, %v31_v3  ;;  %v33_v6 = vld [vmem:[%s1000_s1 + $0x10] sm:$0xff]  ;;  %v36_v7 = vld [vmem:[%s1001_s2 + $0x8] sm:$0xff]  ;;  %v35_v9 = vld [vmem:[%s1001_s2] sm:$0xff]  ;;  %s644_s30 = sshll.u32 %s853_s29, 4  ;;  %s645_s30 = int_to_ptr.vmem [resolvable:$true] %s644_s30 }
  0x11   :  { %732 = vmatpush3.msra.mxu0 %v30_v1  ;;  %56 = vperm.xlu0 %801, %v38_v5   ;;  %v37_v8 = vld [vmem:[%s1001_s2 + $0x10] sm:$0xff]  ;;  %v34_v10 = vld [vmem:[%s1000_s1 + $0x18] sm:$0xff]  ;;  %v662_v13 = vld [vmem:[%s1001_s2 + $0x28] sm:$0xff]  ;;  %s823_s4 = scalar_lea.vmem %s645_s30, 128  ;;  %p828_p6 = scmp.lt.s32.totalorder %s645_s30, %s645_s30 }
  0x12   :  { %733 = vmatprep.subr.mxu0 %v29_v2  ;;  %46 = vperm.xlu1 %802, %v36_v7   ;;  %v664_v11 = vld [vmem:[%s1001_s2 + $0x38] sm:$0xff]  ;;  %v663_v12 = vld [vmem:[%s1001_s2 + $0x30] sm:$0xff]  ;;  %v661_v14 = vld [vmem:[%s1001_s2 + $0x20] sm:$0xff]  ;;  %p824_p5 = scmp.ne.s32.totalorder %s645_s30, %s823_s4  ;;  %p829_p7 = scmp.lt.s32.totalorder %s823_s4, %s823_s4 }
  0x13   :  { %734 = vmatpush3.msra.mxu0 %v29_v2  ;;  %v676_v15 = vld [vmem:[%s1001_s2 + $0x58] sm:$0xff]  ;;  %v675_v16 = vld [vmem:[%s1001_s2 + $0x50] sm:$0xff]  ;;  %v674_v17 = vld [vmem:[%s1001_s2 + $0x48] sm:$0xff] }
  0x14   :  { %736 = vmatmul.mubr.msk.f32.vlgmr.msra.gmra.mxu0 %vm59_vm0, %v32_v4  ;;  %v673_v18 = vld [vmem:[%s1001_s2 + $0x40] sm:$0xff]  ;;  %v688_v19 = vld [vmem:[%s1001_s2 + $0x78] sm:$0xff]  ;;  %v687_v20 = vld [vmem:[%s1001_s2 + $0x70] sm:$0xff]  ;;  %p830_p8 = por %p829_p7, %p828_p6 }
  0x15   :  { %738 = vmatprep.mubr.msk.f32.mxu0 %vm59_vm0, %v33_v6  ;;  %51 = vperm.xlu0 %801, %v37_v8   ;;  %v686_v21 = vld [vmem:[%s1001_s2 + $0x68] sm:$0xff]  ;;  %v685_v22 = vld [vmem:[%s1001_s2 + $0x60] sm:$0xff]  ;;  %v659_v42 = vld [vmem:[%s1000_s1 + $0x30] sm:$0xff] }
  0x16   :  { %41 = vperm.xlu1 %802, %v35_v9   ;;  %v694_v23 = vld [vmem:[%s1001_s2 + $0x80] sm:$0xff]  ;;  %v658_v41 = vld [vmem:[%s1000_s1 + $0x28] sm:$0xff]  ;;  %v660_v43 = vld [vmem:[%s1000_s1 + $0x38] sm:$0xff]  ;;  %p831_p9 = pnand %p830_p8, %p824_p5 }
  0x17   :  { %v657_v24 = vld [vmem:[%s1000_s1 + $0x20] sm:$0xff]  ;;  %v670_v61 = vld [vmem:[%s1000_s1 + $0x48] sm:$0xff]  ;;  %v671_v62 = vld [vmem:[%s1000_s1 + $0x50] sm:$0xff] }
  0x18   :  { %739 = vmatmul.mubr.msk.f32.gmra.mxu0 %vm59_vm0, %v34_v10  ;;  %749 = vmatprep.mubr.msk.f32.mxu1 %vm191_vm1, %v657_v24  ;;  %v669_v44 = vld [vmem:[%s1000_s1 + $0x40] sm:$0xff]  ;;  %v672_v63 = vld [vmem:[%s1000_s1 + $0x58] sm:$0xff] }
  0x19   :  { %188 = vperm.xlu0 %801, %v664_v11   ;;  %763 = vmatprep.mubr.msk.f32.mxu0 %vm191_vm1, %v669_v44  ;;  %v681_v0 = vld [vmem:[%s1000_s1 + $0x60] sm:$0xff] }
  0x1a   :  { %183 = vperm.xlu1 %802, %v663_v12  }
  0x1d   :  { %178 = vperm.xlu0 %801, %v662_v13  }
  0x1e   :  { %173 = vperm.xlu1 %802, %v661_v14  }
  0x21   :  { %320 = vperm.xlu0 %801, %v676_v15  }
  0x22   :  { %315 = vperm.xlu1 %802, %v675_v16  }
  0x25   :  { %310 = vperm.xlu0 %801, %v674_v17   ;;  %v682_v17 = vld [vmem:[%s1000_s1 + $0x68] sm:$0xff] }
  0x26   :  { %305 = vperm.xlu1 %802, %v673_v18   ;;  %v683_v18 = vld [vmem:[%s1000_s1 + $0x70] sm:$0xff] }
  0x29   :  { %451 = vperm.xlu0 %801, %v688_v19   ;;  %v684_v19 = vld [vmem:[%s1000_s1 + $0x78] sm:$0xff] }
  0x2a   :  { %446 = vperm.xlu1 %802, %v687_v20   ;;  %v851_v20 = vmov 0.0  }
  0x2d   :  { %441 = vperm.xlu0 %801, %v686_v21  }
  0x2e   :  { %436 = vperm.xlu1 %802, %v685_v22  }
  0x31   :  { %561 = vperm.xlu0 %801, %v694_v23  }
  0x8c   :  { %v57_v25 = vpop.permute.xlu0 %56 }
  0x8d   :  { %v47_v27 = vpop.permute.xlu1 %46 }
  0x90   :  { %v52_v31 = vpop.permute.xlu0 %51 }
  0x91   :  { %v42_v36 = vpop.permute.xlu1 %41 }
  0x94   :  { %v189_v45 = vpop.permute.xlu0 %188 }
  0x95   :  { %v184_v47 = vpop.permute.xlu1 %183 }
  0x98   :  { %v179_v51 = vpop.permute.xlu0 %178 }
  0x99   :  { %v174_v56 = vpop.permute.xlu1 %173 }
  0x9c   :  { %v321_v1 = vpop.permute.xlu0 %320 }
  0x9d   :  { %v316_v3 = vpop.permute.xlu1 %315 }
  0xa0   :  { %v311_v7 = vpop.permute.xlu0 %310 }
  0xa1   :  { %v306_v12 = vpop.permute.xlu1 %305 }
  0xa4   :  { %v452_v21 = vpop.permute.xlu0 %451 }
  0xa5   :  { %v447_v23 = vpop.permute.xlu1 %446 }
  0xd4   :  { %v737_v26 = vpop.f32.mrf.mxu0 }
  0xd5   :  { %v144_v33 = vadd.f32 %v737_v26, %v47_v27  ;;  %v442_v27 = vpop.permute.xlu0 %441 }
  0xd6   :  { %v138_v28 = vpop.f32.mrf.mxu0 }
  0xd7   :  { %v139_v37 = vadd.f32 %v138_v28, %v42_v36  ;;  %v158_v39 = vmax.f32 %v144_v33, 0.0 }
  0xd8   :  { %v740_v29 = vpop.f32.mrf.mxu0 }
  0xd9   :  { %v154_v30 = vadd.f32 %v740_v29, %v57_v25  ;;  %v157_v40 = vmax.f32 %v139_v37, 0.0  ;;  %v693_v37 = vld [vmem:[%s1000_s1 + $0x80] sm:$0xff] }
  0xda   :  { %v148_v32 = vpop.f32.mrf.mxu0 }
  0xdb   :  { %v160_v34 = vmax.f32 %v154_v30, 0.0  ;;  %v149_v35 = vadd.f32 %v148_v32, %v52_v31  ;;  %v437_v32 = vpop.permute.xlu1 %436 }
  0xdd   :  { %v159_v38 = vmax.f32 %v149_v35, 0.0  ;;  %741 = vmatprep.subr.mxu1 %v160_v34 }
  0xde   :  { %742 = vmatpush3.msra.mxu1 %v160_v34 }
  0xdf   :  { %743 = vmatprep.subr.mxu1 %v159_v38 }
  0xe0   :  { %744 = vmatpush3.msra.mxu1 %v159_v38  ;;  %v562_v38 = vpop.permute.xlu0 %561 }
  0xe1   :  { %745 = vmatprep.subr.mxu1 %v158_v39 }
  0xe2   :  { %746 = vmatpush3.msra.mxu1 %v158_v39 }
  0xe3   :  { %747 = vmatprep.subr.mxu1 %v157_v40 }
  0xe4   :  { %748 = vmatpush3.msra.mxu1 %v157_v40 }
  0xe5   :  { %750 = vmatmul.mubr.msk.f32.vlgmr.msra.gmra.mxu1 %vm191_vm1, %v658_v41 }
  0xe6   :  { %752 = vmatprep.mubr.msk.f32.mxu1 %vm191_vm1, %v659_v42 }
  0xe9   :  { %753 = vmatmul.mubr.msk.f32.gmra.mxu1 %vm191_vm1, %v660_v43 }
  0xea   :  { %777 = vmatprep.mubr.msk.f32.mxu1 %vm191_vm1, %v681_v0 }
 0x1a5   :  { %v751_v46 = vpop.f32.mrf.mxu1 }
 0x1a6   :  { %v276_v53 = vadd.f32 %v751_v46, %v179_v51 }
 0x1a7   :  { %v270_v48 = vpop.f32.mrf.mxu1 }
 0x1a8   :  { %v271_v57 = vadd.f32 %v270_v48, %v174_v56  ;;  %v290_v59 = vmax.f32 %v276_v53, 0.0 }
 0x1a9   :  { %v754_v49 = vpop.f32.mrf.mxu1 }
 0x1aa   :  { %v286_v50 = vadd.f32 %v754_v49, %v189_v45  ;;  %v289_v60 = vmax.f32 %v271_v57, 0.0 }
 0x1ab   :  { %v280_v52 = vpop.f32.mrf.mxu1 }
 0x1ac   :  { %v292_v54 = vmax.f32 %v286_v50, 0.0  ;;  %v281_v55 = vadd.f32 %v280_v52, %v184_v47 }
 0x1ae   :  { %v291_v58 = vmax.f32 %v281_v55, 0.0  ;;  %755 = vmatprep.subr.mxu0 %v292_v54 }
 0x1af   :  { %756 = vmatpush3.msra.mxu0 %v292_v54 }
 0x1b0   :  { %757 = vmatprep.subr.mxu0 %v291_v58 }
 0x1b1   :  { %758 = vmatpush3.msra.mxu0 %v291_v58 }
 0x1b2   :  { %759 = vmatprep.subr.mxu0 %v290_v59 }
 0x1b3   :  { %760 = vmatpush3.msra.mxu0 %v290_v59 }
 0x1b4   :  { %761 = vmatprep.subr.mxu0 %v289_v60 }
 0x1b5   :  { %762 = vmatpush3.msra.mxu0 %v289_v60 }
 0x1b6   :  { %764 = vmatmul.mubr.msk.f32.vlgmr.msra.gmra.mxu0 %vm191_vm1, %v670_v61  ;;  %783 = vmatprep.subr.mxu0 %v851_v20 }
 0x1b7   :  { %766 = vmatprep.mubr.msk.f32.mxu0 %vm191_vm1, %v671_v62 }
 0x1ba   :  { %767 = vmatmul.mubr.msk.f32.gmra.mxu0 %vm191_vm1, %v672_v63 }
 0x1bb   :  { %791 = vmatprep.mubr.msk.f32.mxu0 %vm852_vm2, %v851_v20 }
 0x276   :  { %v765_v2 = vpop.f32.mrf.mxu0 }
 0x277   :  { %v407_v9 = vadd.f32 %v765_v2, %v311_v7 }
 0x278   :  { %v401_v4 = vpop.f32.mrf.mxu0 }
 0x279   :  { %v402_v13 = vadd.f32 %v401_v4, %v306_v12  ;;  %v421_v15 = vmax.f32 %v407_v9, 0.0 }
 0x27a   :  { %v768_v5 = vpop.f32.mrf.mxu0 }
 0x27b   :  { %v417_v6 = vadd.f32 %v768_v5, %v321_v1  ;;  %v420_v16 = vmax.f32 %v402_v13, 0.0 }
 0x27c   :  { %v411_v8 = vpop.f32.mrf.mxu0 }
 0x27d   :  { %v423_v10 = vmax.f32 %v417_v6, 0.0  ;;  %v412_v11 = vadd.f32 %v411_v8, %v316_v3 }
 0x27f   :  { %v422_v14 = vmax.f32 %v412_v11, 0.0  ;;  %769 = vmatprep.subr.mxu1 %v423_v10 }
 0x280   :  { %770 = vmatpush3.msra.mxu1 %v423_v10 }
 0x281   :  { %771 = vmatprep.subr.mxu1 %v422_v14 }
 0x282   :  { %772 = vmatpush3.msra.mxu1 %v422_v14 }
 0x283   :  { %773 = vmatprep.subr.mxu1 %v421_v15 }
 0x284   :  { %774 = vmatpush3.msra.mxu1 %v421_v15 }
 0x285   :  { %775 = vmatprep.subr.mxu1 %v420_v16 }
 0x286   :  { %776 = vmatpush3.msra.mxu1 %v420_v16 }
 0x287   :  { %778 = vmatmul.mubr.msk.f32.vlgmr.msra.gmra.mxu1 %vm191_vm1, %v682_v17 }
 0x288   :  { %780 = vmatprep.mubr.msk.f32.mxu1 %vm191_vm1, %v683_v18 }
 0x28b   :  { %781 = vmatmul.mubr.msk.f32.gmra.mxu1 %vm191_vm1, %v684_v19 }
 0x347   :  { %v779_v22 = vpop.f32.mrf.mxu1 }
 0x348   :  { %v538_v29 = vadd.f32 %v779_v22, %v442_v27 }
 0x349   :  { %v532_v24 = vpop.f32.mrf.mxu1 }
 0x34a   :  { %v533_v33 = vadd.f32 %v532_v24, %v437_v32  ;;  %v552_v35 = vmax.f32 %v538_v29, 0.0 }
 0x34b   :  { %v782_v25 = vpop.f32.mrf.mxu1 }
 0x34c   :  { %v548_v26 = vadd.f32 %v782_v25, %v452_v21  ;;  %v551_v36 = vmax.f32 %v533_v33, 0.0 }
 0x34d   :  { %v542_v28 = vpop.f32.mrf.mxu1 }
 0x34e   :  { %v554_v30 = vmax.f32 %v548_v26, 0.0  ;;  %v543_v31 = vadd.f32 %v542_v28, %v447_v23 }
 0x350   :  { %v553_v34 = vmax.f32 %v543_v31, 0.0  ;;  %784 = vmatpush3.msra.mxu0 %v554_v30 }
 0x351   :  { %785 = vmatprep.subr.mxu0 %v851_v20 }
 0x352   :  { %786 = vmatpush3.msra.mxu0 %v553_v34 }
 0x353   :  { %787 = vmatprep.subr.mxu0 %v851_v20 }
 0x354   :  { %788 = vmatpush3.msra.mxu0 %v552_v35 }
 0x355   :  { %789 = vmatprep.subr.mxu0 %v851_v20 }
 0x356   :  { %790 = vmatpush3.msra.mxu0 %v551_v36 }
 0x357   :  { %792 = vmatmul.mubr.msk.f32.vlgmr.msra.gmra.mxu0 %vm191_vm1, %v693_v37 }
 0x417   :  { %v633_v39 = vpop.f32.mrf.mxu0 }
 0x418   :  { %v634_v40 = vadd.f32 %v633_v39, %v562_v38 }
 0x419   :  { %v793_v41 = vpop.f32.mrf.mxu0 }
 0x41a   :  { %637 = vst [vmem:[#allocation5] sm:$0xff] %v634_v40 }
 0x41b   :  { %834 = shalt.err (!%p831_p9)
}
 0x41c   :  { %647 = dma.vmem_to_hbm [thread:$0]  %s645_s30, 128, %s1002_s3, [#allocation4]  }
 0x41d   :  { %845 = dma.done.wait [#allocation4], 128  }
 0x41e   :  { %846 = vsyncadd [#allocation4], 4294967168 }
 0x41f   :  { %651 = vsyncpa [#allocation3], 1 }
 0x420   :  { %652 = vsyncpa [#allocation4], 1 }

</bundles_post_ra>
